<compile_context>
chip_gen: v6e
topology: v6e:2x2x1
jax: 0.10.0
libtpu: 0.0.40
codegen_flags: <defaults>
</compile_context>

<pallas_src>
import functools

import jax
import jax.numpy as jnp
from jax import lax
from jax.experimental import pallas as pl
from jax.experimental.pallas import tpu as pltpu


def _round_up(x: int, m: int) -> int:
    return ((x + m - 1) // m) * m


def _vmem_budget_bytes() -> int:
    """Generation-aware VMEM budget (headroom below physical per-core capacity)."""
    cap = 64 << 20  # conservative fallback: v7x per-TensorCore VMEM
    try:
        cap = int(pltpu.get_tpu_info().vmem_capacity_bytes)
    except Exception:
        pass
    # 75% of physical, never more than 96 MiB -> 96 MiB on v5e/v6e, 48 MiB on v7x.
    return min(int(cap * 3 // 4), 96 << 20)


def _tile_footprint_bytes(tm, tn, tk, in_itemsize, out_itemsize) -> int:
    x_bufs = 2 * tm * tk * in_itemsize       # double-buffered activation tiles
    w_bufs = 3 * tn * tk * in_itemsize       # up to triple-buffered weight tiles
    b_bufs = 2 * tn * in_itemsize            # bias tile (tiny)
    o_bufs = 2 * tm * tn * out_itemsize      # output tiles
    acc = tm * tn * 4                        # f32 accumulator scratch
    return x_bufs + w_bufs + b_bufs + o_bufs + acc


def _default_tile_caps(in_itemsize, out_itemsize, budget):
    """Large tile caps, shrunk (TK first, then TN, then TM) to fit the VMEM budget."""
    tm, tn = 1024, 512
    tk = 2048 if in_itemsize <= 2 else 1024
    while _tile_footprint_bytes(tm, tn, tk, in_itemsize, out_itemsize) > budget:
        if tk > 256:
            tk //= 2
        elif tn > 256:
            tn //= 2
        elif tm > 128:
            tm //= 2
        else:
            break
    return tm, tn, tk


def _choose_tile(dim: int, cap: int, align: int) -> int:
    """Pick a tile size (multiple of `align`, <= cap) for an axis of length `dim`.

    Prefers a tile that divides round_up(dim, align) so no extra padding / output
    slicing is needed; falls back to the full cap (accepting padding) only when the
    best divisor would be less than half the cap.
    """
    cap = max(align, (cap // align) * align)
    padded = _round_up(dim, align)
    if padded <= cap:
        return padded  # single block along this axis
    n_units = padded // align
    best = align
    for t in range(cap // align, 0, -1):
        if n_units % t == 0:
            best = t * align
            break
    if best * 2 >= cap:
        return best
    return cap


def _linear_head_kernel(x_ref, w_ref, b_ref, o_ref, acc_ref, *, mxu_dtype):
    # x_ref: (TM, TK)   w_ref: (TN, TK) (weight kept in native (O, H) layout)
    # b_ref: (1, TN)    o_ref: (TM, TN)
    # acc_ref: (TM, TN) f32 scratch, resident across the K grid axis.
    k = pl.program_id(2)

    x = x_ref[...]
    w = w_ref[...]
    if mxu_dtype is not None:
        x = x.astype(mxu_dtype)
        w = w.astype(mxu_dtype)

    # x @ w.T on the MXU: contract the last dims of both operands (no transpose of
    # the weight is ever materialized in HBM/the wrapper).
    prod = lax.dot_general(
        x, w,
        dimension_numbers=(((1,), (1,)), ((), ())),
        preferred_element_type=jnp.float32,
    )

    @pl.when(k == 0)
    def _():
        acc_ref[...] = prod          # direct assign: no zero-fill store + add

    @pl.when(k > 0)
    def _():
        acc_ref[...] += prod

    @pl.when(k == pl.num_programs(2) - 1)
    def _():
        # Bias added exactly once, in f32, then downcast on the single store.
        o_ref[...] = (acc_ref[...] + b_ref[...].astype(jnp.float32)).astype(o_ref.dtype)


def reach_pong_chow_kong_head(h, weight, bias, *, tile_caps=None, mxu_dtype=None):
    """h: (..., H), weight: (O, H), bias: (O,) -> (..., O)   (== h @ W^T + b).

    tile_caps: optional (tm_cap, tn_cap, tk_cap) override (mainly for testing).
    mxu_dtype: optionally cast operands for the MXU feed (e.g. jnp.bfloat16) while
               accumulating in f32; default None keeps the input dtype's numerics.
    """
    orig_shape = h.shape
    H = orig_shape[-1]
    O, H_w = weight.shape
    assert H_w == H, (weight.shape, H)

    x = h.reshape(-1, H)
    N = x.shape[0]

    in_itemsize = max(jnp.dtype(h.dtype).itemsize, jnp.dtype(weight.dtype).itemsize)
    if mxu_dtype is not None:
        in_itemsize = max(in_itemsize, jnp.dtype(mxu_dtype).itemsize)
    out_itemsize = jnp.dtype(h.dtype).itemsize

    budget = _vmem_budget_bytes()
    if tile_caps is None:
        tm_cap, tn_cap, tk_cap = _default_tile_caps(in_itemsize, out_itemsize, budget)
    else:
        tm_cap, tn_cap, tk_cap = tile_caps

    TM = _choose_tile(N, tm_cap, 8)      # rows: sublane-aligned
    TN = _choose_tile(O, tn_cap, 128)    # output cols: lane-aligned (dense stores)
    TK = _choose_tile(H, tk_cap, 128)    # contraction: lane-aligned MXU feed

    N_pad = _round_up(N, TM)
    O_pad = _round_up(O, TN)
    H_pad = _round_up(H, TK)

    # Zero-pad only when a dim is not tile-aligned (never for typical 128-aligned
    # transformer heads). Zeros along K contribute nothing; extra rows/cols sliced off.
    x_p = x if (N_pad, H_pad) == (N, H) else jnp.pad(x, ((0, N_pad - N), (0, H_pad - H)))
    w_p = (weight if (O_pad, H_pad) == (O, H)
           else jnp.pad(weight, ((0, O_pad - O), (0, H_pad - H))))
    b_p = bias.reshape(1, O)
    if O_pad != O:
        b_p = jnp.pad(b_p, ((0, 0), (0, O_pad - O)))

    grid = (N_pad // TM, O_pad // TN, H_pad // TK)
    k_steps = grid[2]

    # Weight stream: deepen the pipeline when the reduction axis is deep enough to
    # expose HBM latency (helps v5e most; near-zero cost on v6e/v7x).
    w_index_map = lambda i, j, k: (j, k)
    w_spec = pl.BlockSpec((TN, TK), w_index_map)
    if k_steps >= 3 and hasattr(pl, "Buffered"):
        try:
            w_spec = pl.BlockSpec((TN, TK), w_index_map, pipeline_mode=pl.Buffered(3))
        except TypeError:
            pass  # older BlockSpec signature: fall back to default double-buffering

    flops = 2 * N_pad * O_pad * H_pad
    bytes_accessed = int(
        (O_pad // TN) * N_pad * H_pad * jnp.dtype(h.dtype).itemsize        # x re-reads
        + (N_pad // TM) * O_pad * H_pad * jnp.dtype(weight.dtype).itemsize  # W re-reads
        + O_pad * jnp.dtype(bias.dtype).itemsize
        + N_pad * O_pad * out_itemsize
    )
    cost = pl.CostEstimate(flops=flops, transcendentals=0, bytes_accessed=bytes_accessed)

    kernel = functools.partial(_linear_head_kernel, mxu_dtype=mxu_dtype)

    out_p = pl.pallas_call(
        kernel,
        out_shape=jax.ShapeDtypeStruct((N_pad, O_pad), h.dtype),
        grid_spec=pltpu.PrefetchScalarGridSpec(
            num_scalar_prefetch=0,
            grid=grid,
            in_specs=[
                pl.BlockSpec((TM, TK), lambda i, j, k: (i, k)),   # activations
                w_spec,                                            # weight, native (O, H)
                pl.BlockSpec((1, TN), lambda i, j, k: (0, j)),    # bias, resident per j
            ],
            out_specs=pl.BlockSpec((TM, TN), lambda i, j, k: (i, j)),
            scratch_shapes=[pltpu.VMEM((TM, TN), jnp.float32)],
        ),
        compiler_params=pltpu.CompilerParams(
            dimension_semantics=("parallel", "parallel", "arbitrary"),
            vmem_limit_bytes=budget,
        ),
        cost_estimate=cost,
    )(x_p, w_p, b_p)

    out = out_p if (N_pad == N and O_pad == O) else out_p[:N, :O]
    return out.reshape(*orig_shape[:-1], O)


if __name__ == "__main__":
    key = jax.random.PRNGKey(0)
    k_h, k_w, k_h2, k_w2 = jax.random.split(key, 4)

    # --- Test 1: module-scale shapes (batch=2, seq=8, hidden=32, output_dim=16) ----
    batch, seq, hidden, output_dim = 2, 8, 32, 16
    h = jax.random.normal(k_h, (batch, seq, hidden), dtype=jnp.float32)
    weight = jax.random.normal(k_w, (output_dim, hidden), dtype=jnp.float32) * (
        1.0 / hidden ** 0.5
    )
    bias = jnp.zeros((output_dim,), dtype=jnp.float32)  # module inits bias to zeros

    out = reach_pong_chow_kong_head(h, weight, bias)
    out = jax.block_until_ready(out)
    ref = h @ weight.T + bias
    assert out.shape == (batch, seq, output_dim)
    assert jnp.allclose(out, ref, atol=1e-5, rtol=1e-5)

    # --- Test 2: force a multi-tile (2, 2, 3) grid to exercise the K accumulator,
    #     divisor tile selection and the triple-buffered weight stream. -------------
    b2, s2, hid2, od2 = 2, 64, 384, 256
    h2 = jax.random.normal(k_h2, (b2, s2, hid2), dtype=jnp.float32)
    w2 = jax.random.normal(k_w2, (od2, hid2), dtype=jnp.float32) * (1.0 / hid2 ** 0.5)
    b2v = jax.random.normal(key, (od2,), dtype=jnp.float32) * 0.1

    out_big = reach_pong_chow_kong_head(h2, w2, b2v, tile_caps=(64, 128, 128))
    out_big = jax.block_until_ready(out_big)
    ref_big = (
        jnp.dot(h2.reshape(-1, hid2), w2.T, precision=jax.lax.Precision.HIGHEST) + b2v
    ).reshape(b2, s2, od2)
    assert out_big.shape == (b2, s2, od2)
    assert jnp.allclose(out_big, ref_big, atol=1e-4, rtol=1e-4)

    print("KERNEL_OK")
</pallas_src>

<mosaic_0001>
module attributes {stable_mosaic.version = 11 : i64} {
  func.func @_linear_head_kernel(%arg0: i32, %arg1: i32, %arg2: i32, %arg3: memref<16x128xf32, #tpu.memory_space<vmem>>, %arg4: memref<128x128xf32, #tpu.memory_space<vmem>>, %arg5: memref<1x128xf32, #tpu.memory_space<vmem>>, %arg6: memref<16x128xf32, #tpu.memory_space<vmem>>, %arg7: memref<16x128xf32, #tpu.memory_space<vmem>>) attributes {dimension_semantics = [#tpu.dimension_semantics<parallel>, #tpu.dimension_semantics<parallel>, #tpu.dimension_semantics<arbitrary>], iteration_bounds = array<i64: 1, 1, 1>, scalar_prefetch = 0 : i64, scratch_operands = 1 : i64, tpu.core_type = #tpu.core_type<tc>, window_params = [{transform_indices = @transform_0, window_bounds = array<i64: 16, 128>}, {transform_indices = @transform_1, window_bounds = array<i64: 128, 128>}, {transform_indices = @transform_2, window_bounds = array<i64: 1, 128>}, {transform_indices = @transform_3, window_bounds = array<i64: 16, 128>}]} {
    %c0 = arith.constant 0 : index
    %c0_0 = arith.constant 0 : index
    %0 = vector.load %arg3[%c0, %c0_0] : memref<16x128xf32, #tpu.memory_space<vmem>>, vector<16x128xf32>
    %c0_1 = arith.constant 0 : index
    %c0_2 = arith.constant 0 : index
    %1 = vector.load %arg4[%c0_1, %c0_2] : memref<128x128xf32, #tpu.memory_space<vmem>>, vector<128x128xf32>
    %cst = arith.constant dense<0.000000e+00> : vector<16x128xf32>
    %2 = tpu.matmul %0, %1, %cst {dimension_numbers = #tpu.dot_dimension_numbers<[1], [1], [0], [0], [0, 0, 1, 0], [], []>} : vector<16x128xf32>, vector<128x128xf32>, vector<16x128xf32> -> vector<16x128xf32>
    %c0_i32 = arith.constant 0 : i32
    %3 = arith.cmpi eq, %arg2, %c0_i32 : i32
    %4 = arith.extui %3 : i1 to i32
    %c0_i32_3 = arith.constant 0 : i32
    %5 = arith.cmpi ne, %4, %c0_i32_3 : i32
    scf.if %5 {
      %c0_8 = arith.constant 0 : index
      %c0_9 = arith.constant 0 : index
      %12 = vector.load %arg7[%c0_8, %c0_9] : memref<16x128xf32, #tpu.memory_space<vmem>>, vector<16x128xf32>
      tpu.vector_store %arg7[%c0_8, %c0_9], %2 {strides = array<i32>} : memref<16x128xf32, #tpu.memory_space<vmem>>, vector<16x128xf32>,
    } else {
    }
    %c0_i32_4 = arith.constant 0 : i32
    %6 = arith.cmpi sgt, %arg2, %c0_i32_4 : i32
    %7 = arith.extui %6 : i1 to i32
    %c0_i32_5 = arith.constant 0 : i32
    %8 = arith.cmpi ne, %7, %c0_i32_5 : i32
    scf.if %8 {
      %c0_8 = arith.constant 0 : index
      %c0_9 = arith.constant 0 : index
      %12 = vector.load %arg7[%c0_8, %c0_9] : memref<16x128xf32, #tpu.memory_space<vmem>>, vector<16x128xf32>
      %13 = arith.addf %12, %2 : vector<16x128xf32>
      %c0_10 = arith.constant 0 : index
      %c0_11 = arith.constant 0 : index
      %14 = vector.load %arg7[%c0_10, %c0_11] : memref<16x128xf32, #tpu.memory_space<vmem>>, vector<16x128xf32>
      tpu.vector_store %arg7[%c0_10, %c0_11], %13 {strides = array<i32>} : memref<16x128xf32, #tpu.memory_space<vmem>>, vector<16x128xf32>,
    } else {
    }
    %c0_i32_6 = arith.constant 0 : i32
    %9 = arith.cmpi eq, %arg2, %c0_i32_6 : i32
    %10 = arith.extui %9 : i1 to i32
    %c0_i32_7 = arith.constant 0 : i32
    %11 = arith.cmpi ne, %10, %c0_i32_7 : i32
    scf.if %11 {
      %c0_8 = arith.constant 0 : index
      %c0_9 = arith.constant 0 : index
      %12 = vector.load %arg7[%c0_8, %c0_9] : memref<16x128xf32, #tpu.memory_space<vmem>>, vector<16x128xf32>
      %c0_10 = arith.constant 0 : index
      %c0_11 = arith.constant 0 : index
      %13 = vector.load %arg5[%c0_10, %c0_11] : memref<1x128xf32, #tpu.memory_space<vmem>>, vector<1x128xf32>
      %14 = vector.broadcast %13 : vector<1x128xf32> to vector<16x128xf32>
      %15 = arith.addf %12, %14 : vector<16x128xf32>
      %c0_12 = arith.constant 0 : index
      %c0_13 = arith.constant 0 : index
      %16 = vector.load %arg6[%c0_12, %c0_13] : memref<16x128xf32, #tpu.memory_space<vmem>>, vector<16x128xf32>
      tpu.vector_store %arg6[%c0_12, %c0_13], %15 {strides = array<i32>} : memref<16x128xf32, #tpu.memory_space<vmem>>, vector<16x128xf32>,
    } else {
    }
    return
  }
  func.func @transform_0(%arg0: i32, %arg1: i32, %arg2: i32) -> (i32, i32) {
    %c0_i32 = arith.constant 0 : i32
    return %arg0, %arg2 : i32, i32
  }
  func.func @transform_1(%arg0: i32, %arg1: i32, %arg2: i32) -> (i32, i32) {
    %c0_i32 = arith.constant 0 : i32
    return %arg1, %arg2 : i32, i32
  }
  func.func @transform_2(%arg0: i32, %arg1: i32, %arg2: i32) -> (i32, i32) {
    %c0_i32 = arith.constant 0 : i32
    %c0_i32_0 = arith.constant 0 : i32
    return %c0_i32, %arg1 : i32, i32
  }
  func.func @transform_3(%arg0: i32, %arg1: i32, %arg2: i32) -> (i32, i32) {
    %c0_i32 = arith.constant 0 : i32
    return %arg0, %arg1 : i32, i32
  }
}

</mosaic_0001>

<bundles_post_ra>
// kernel: tpu_custom_call.1
= control target key start
LH: loop header
LB: loop body
LE: loop exit
PB: predicated region body
PF: predicated region fallthrough
CT: control target
= control target key end

     0   :  { %8 = vsyncpa [#allocation4], 0  ;;  %s357_s0 = inlined_call_operand.hbm [shape: f32[16,128], index: 0, kind: input, shape index: {}]   ;;  %s358_s1 = inlined_call_operand.hbm [shape: f32[128,128], index: 1, kind: input, shape index: {}]   ;;  %s359_s2 = inlined_call_operand.vmem [shape: f32[1,128], index: 2, kind: input, shape index: {}]   ;;  %s360_s3 = inlined_call_operand.hbm [shape: f32[16,128], index: 3, kind: output, shape index: {}]  }
   0x1   :  { %9 = vsyncpa [#allocation7], 0 }
   0x2   :  { %10 = vsyncpa [#allocation5], 0  ;;  %s311_s12 = smov [#allocation3]  }
   0x3   :  { %s16_s13 = sshll.u32 %s311_s12, 4  ;;  %s17_s13 = int_to_ptr.vmem [resolvable:$true] %s16_s13 }
   0x4   :  { %s253_s14 = scalar_lea.vmem %s17_s13, 256  ;;  %p258_p1 = scmp.lt.s32.totalorder %s17_s13, %s17_s13 }
   0x5   :  { %p254_p0 = scmp.ne.s32.totalorder %s17_s13, %s253_s14  ;;  %p259_p2 = scmp.lt.s32.totalorder %s253_s14, %s253_s14 }
   0x7   :  { %p260_p3 = por %p259_p2, %p258_p1 }
   0x9   :  { %p261_p4 = pnand %p260_p3, %p254_p0 }
   0xb   :  { %264 = shalt.err (!%p261_p4)
}
   0xc   :  { %s312_s15 = smov 128   ;;  %s313_s16 = smov 8  }
   0xd   :  { %22 = dma.hbm_to_vmem [thread:$0]  %s357_s0, 256, %s17_s13, [#allocation4], %s312_s15, %s312_s15, %s313_s16  }
   0xe   :  { %s314_s19 = smov [#allocation6]  }
   0xf   :  { %s28_s20 = sshll.u32 %s314_s19, 4  ;;  %s29_s20 = int_to_ptr.vmem [resolvable:$true] %s28_s20 }
  0x10   :  { %s273_s21 = scalar_lea.vmem %s29_s20, 2048  ;;  %p278_p6 = scmp.lt.s32.totalorder %s29_s20, %s29_s20 }
  0x11   :  { %p274_p5 = scmp.ne.s32.totalorder %s29_s20, %s273_s21  ;;  %p279_p7 = scmp.lt.s32.totalorder %s273_s21, %s273_s21 }
  0x13   :  { %p280_p8 = por %p279_p7, %p278_p6 }
  0x15   :  { %p281_p9 = pnand %p280_p8, %p274_p5 }
  0x17   :  { %284 = shalt.err (!%p281_p9)
}
  0x18   :  { %34 = dma.hbm_to_vmem [thread:$0]  %s358_s1, 2048, %s29_s20, [#allocation7], %s312_s15, %s312_s15, %s313_s16  }
  0x19   :  { %305 = dma.done.wait [#allocation4], 256  }
  0x1a   :  { %306 = vsyncadd [#allocation4], 4294967040 }
  0x1b   :  { %307 = dma.done.wait [#allocation7], 2048  }
  0x1c   :  { %308 = vsyncadd [#allocation7], 4294965248  ;;  %v60_v0 = vld [vmem:[#allocation6 + $0x78] sm:$0xff]  ;;  %v59_v1 = vld [vmem:[#allocation6 + $0x70] sm:$0xff]  ;;  %s315_s24 = smov [#allocation8]  }
  0x1d   :  { %205 = vmatprep.subr.mxu0 %v60_v0  ;;  %v58_v2 = vld [vmem:[#allocation6 + $0x68] sm:$0xff]  ;;  %v43_v3 = vld [vmem:[#allocation3] sm:$0xff]  ;;  %v57_v4 = vld [vmem:[#allocation6 + $0x60] sm:$0xff]  ;;  %s173_s25 = sshll.u32 %s315_s24, 4  ;;  %s174_s25 = int_to_ptr.vmem [resolvable:$true] %s173_s25 }
  0x1e   :  { %206 = vmatpush3.xpose.msra.mxu0 %v60_v0  ;;  %237 = vmatprep.mubr.f32.mxu0 %v43_v3  ;;  %v56_v5 = vld [vmem:[#allocation6 + $0x58] sm:$0xff]  ;;  %v55_v6 = vld [vmem:[#allocation6 + $0x50] sm:$0xff]  ;;  %v54_v7 = vld [vmem:[#allocation6 + $0x48] sm:$0xff]  ;;  %s285_s26 = scalar_lea.vmem %s174_s25, 256  ;;  %p290_p11 = scmp.lt.s32.totalorder %s174_s25, %s174_s25 }
  0x1f   :  { %207 = vmatprep.subr.mxu0 %v59_v1  ;;  %v53_v8 = vld [vmem:[#allocation6 + $0x40] sm:$0xff]  ;;  %v52_v9 = vld [vmem:[#allocation6 + $0x38] sm:$0xff]  ;;  %v51_v10 = vld [vmem:[#allocation6 + $0x30] sm:$0xff]  ;;  %p286_p10 = scmp.ne.s32.totalorder %s174_s25, %s285_s26  ;;  %p291_p12 = scmp.lt.s32.totalorder %s285_s26, %s285_s26 }
  0x20   :  { %v50_v11 = vld [vmem:[#allocation6 + $0x28] sm:$0xff]  ;;  %v49_v12 = vld [vmem:[#allocation6 + $0x20] sm:$0xff]  ;;  %v48_v13 = vld [vmem:[#allocation6 + $0x18] sm:$0xff] }
  0x21   :  { %v47_v14 = vld [vmem:[#allocation6 + $0x10] sm:$0xff]  ;;  %v46_v15 = vld [vmem:[#allocation6 + $0x8] sm:$0xff]  ;;  %v45_v16 = vld [vmem:[#allocation6] sm:$0xff]  ;;  %p292_p13 = por %p291_p12, %p290_p11 }
  0x22   :  { %208 = vmatpush3.xpose.msra.mxu0 %v59_v1  ;;  %v44_v17 = vld [vmem:[#allocation3 + $0x8] sm:$0xff]  ;;  %v186_v18 = vld [vmem:[%s359_s2] ss:$0 sm:$0xff] }
  0x23   :  { %209 = vmatprep.subr.mxu0 %v58_v2  ;;  %p293_p0 = pnand %p292_p13, %p286_p10 }
  0x26   :  { %210 = vmatpush3.xpose.msra.mxu0 %v58_v2 }
  0x27   :  { %211 = vmatprep.subr.mxu0 %v57_v4 }
  0x2a   :  { %212 = vmatpush3.xpose.msra.mxu0 %v57_v4 }
  0x2b   :  { %213 = vmatprep.subr.mxu0 %v56_v5 }
  0x2e   :  { %214 = vmatpush3.xpose.msra.mxu0 %v56_v5 }
  0x2f   :  { %215 = vmatprep.subr.mxu0 %v55_v6 }
  0x32   :  { %216 = vmatpush3.xpose.msra.mxu0 %v55_v6 }
  0x33   :  { %217 = vmatprep.subr.mxu0 %v54_v7 }
  0x36   :  { %218 = vmatpush3.xpose.msra.mxu0 %v54_v7 }
  0x37   :  { %219 = vmatprep.subr.mxu0 %v53_v8 }
  0x3a   :  { %220 = vmatpush3.xpose.msra.mxu0 %v53_v8 }
  0x3b   :  { %221 = vmatprep.subr.mxu0 %v52_v9 }
  0x3e   :  { %222 = vmatpush3.xpose.msra.mxu0 %v52_v9 }
  0x3f   :  { %223 = vmatprep.subr.mxu0 %v51_v10 }
  0x42   :  { %224 = vmatpush3.xpose.msra.mxu0 %v51_v10 }
  0x43   :  { %225 = vmatprep.subr.mxu0 %v50_v11 }
  0x46   :  { %226 = vmatpush3.xpose.msra.mxu0 %v50_v11 }
  0x47   :  { %227 = vmatprep.subr.mxu0 %v49_v12 }
  0x4a   :  { %228 = vmatpush3.xpose.msra.mxu0 %v49_v12 }
  0x4b   :  { %229 = vmatprep.subr.mxu0 %v48_v13 }
  0x4e   :  { %230 = vmatpush3.xpose.msra.mxu0 %v48_v13 }
  0x4f   :  { %231 = vmatprep.subr.mxu0 %v47_v14 }
  0x52   :  { %232 = vmatpush3.xpose.msra.mxu0 %v47_v14 }
  0x53   :  { %233 = vmatprep.subr.mxu0 %v46_v15 }
  0x56   :  { %234 = vmatpush3.xpose.msra.mxu0 %v46_v15 }
  0x57   :  { %235 = vmatprep.subr.mxu0 %v45_v16 }
  0x5a   :  { %236 = vmatpush3.xpose.msra.mxu0 %v45_v16 }
  0x5d   :  { %238 = vmatmul.mubr.f32.vlgmr.msra.gmra.mxu0 %v44_v17 }
 0x11d   :  { %v239_v19 = vpop.f32.mrf.mxu0 }
 0x11e   :  { %v165_v20 = vadd.f32 %v239_v19, %v186_v18 }
 0x11f   :  { %v127_v21 = vpop.f32.mrf.mxu0 }
 0x120   :  { %167 = vst [vmem:[#allocation8 + $0x8] sm:$0xff] %v165_v20  ;;  %v164_v22 = vadd.f32 %v186_v18, %v127_v21 }
 0x122   :  { %166 = vst [vmem:[#allocation8] sm:$0xff] %v164_v22 }
 0x123   :  { %296 = shalt.err (!%p293_p0)
}
 0x124   :  { %179 = dma.vmem_to_hbm [thread:$0]  %s174_s25, 256, %s360_s3, [#allocation5], %s312_s15, %s312_s15, %s313_s16  }
 0x125   :  { %309 = dma.done.wait [#allocation5], 256  }
 0x126   :  { %310 = vsyncadd [#allocation5], 4294967040 }
 0x127   :  { %183 = vsyncpa [#allocation4], 1 }
 0x128   :  { %184 = vsyncpa [#allocation7], 1 }
 0x129   :  { %185 = vsyncpa [#allocation5], 1 }

</bundles_post_ra>
